<compile_context>
chip_gen: v7x
topology: tpu7x:2x2x1
jax: 0.10.0
libtpu: 0.0.40
codegen_flags: <defaults>
</compile_context>

<pallas_src>
import functools

import jax
import jax.numpy as jnp
import numpy as np
from jax.experimental import pallas as pl
from jax.experimental.pallas import tpu as pltpu

KH = KW = 5  # Attention.cnn 5x5 kernel


# ----------------------------------------------------------------------------
# Pallas kernel: full Attention.forward for one (arm, batch-tile)
#   x = einsum('ijk,ij->ijk', x, senti)
#   h = ReLU(Conv2d(1,1,(5,5))(x))           -> 5 row windows x banded matmuls
#   g = Sigmoid(Conv2d(1,1,(Lc,Ec))(h))      -> per-plane scalar gate
#   o = h * g
#   y = Tanh(Conv2d(1,C,(1,Ec))(o))          -> (Bt*Lq, E) @ (E, C)
#   out = ReLU(MaxPool2d((Lc,1))(y))         -> masked row-max (+ fcLayer ReLU)
# ----------------------------------------------------------------------------
def attention_kernel(x_ref, s_ref, wm_ref, bc_ref, wa_ref, ba_ref, w1_ref,
                     b1_ref, o_ref, *, lc, lq):
    """x_ref : (Bt, Lpad, E)   reviews (zero row padding beyond L)
       s_ref : (Bt, Lpad, 1)   senti scores
       wm_ref: (KH, E, E)      banded shift-weight matrices for the 5x5 conv
       wa_ref: (Lq, E)         attention_layer weight, zero outside (Lc, Ec)
       w1_ref: (E, C)          cnn1 weight, zero rows for cols >= Ec
       b1_ref: (1, C)
       o_ref : (Bt, 1, C)
    """
    arm = pl.program_id(0)
    bt = x_ref.shape[0]
    e = x_ref.shape[2]
    c = w1_ref.shape[1]
    rq = bt * lq

    # Conv2d(1,1,(5,5)) "valid", as 5 sublane-offset row windows x (E,E) matmuls
    # on the MXU; the banded matrices already zero the invalid output columns.
    acc = jnp.zeros((rq, e), jnp.float32)
    for dr in range(KH):
        win = x_ref[:, dr:dr + lq, :] * s_ref[:, dr:dr + lq, :]   # (Bt, Lq, E)
        acc = acc + jnp.dot(win.reshape(rq, e), wm_ref[dr],
                            preferred_element_type=jnp.float32)
    h = jnp.maximum(acc + bc_ref[arm], 0.0)                       # ReLU
    h3 = h.reshape(bt, lq, e)

    # attention_layer: Conv2d(1,1,(Lc,Ec)) + Sigmoid -> one scalar gate / plane.
    # Junk rows / columns of h hit zeros in the padded weight.
    pm = h3 * wa_ref[...]
    score = jnp.sum(jnp.sum(pm, axis=1, keepdims=True), axis=2, keepdims=True)
    gate = jax.nn.sigmoid(score + ba_ref[arm])                    # (Bt, 1, 1)
    gated = (h3 * gate).reshape(rq, e)

    # cnn1: Conv2d(1, C, (1, Ec)) == (Bt*Lq, E) @ (E, C), + Tanh.
    y = jnp.dot(gated, w1_ref[...], preferred_element_type=jnp.float32)
    t = jnp.tanh(y.reshape(bt, lq, c) + b1_ref[...])              # (Bt, Lq, C)

    # MaxPool2d((Lc, 1)): mask conv-invalid / padded rows, max over rows.
    row = jax.lax.broadcasted_iota(jnp.int32, (bt, lq, c), 1)
    t = jnp.where(row < lc, t, -2.0)                              # tanh in (-1,1)
    m = jnp.max(t, axis=1)                                        # (Bt, C)

    # SentiAttn.fcLayer (ReLU) folded in.
    o_ref[...] = jnp.maximum(m, 0.0)[:, None, :]


# ----------------------------------------------------------------------------
# Host-side helpers
# ----------------------------------------------------------------------------
def _round_up(n, m):
    return -(-n // m) * m


def _pick_batch_tile(batch, lpad, embed, budget_bytes=2 << 20):
    """Largest divisor of `batch` whose double-buffered x block fits the budget."""
    lanes = max(_round_up(embed, 128), 128)
    subl = _round_up(lpad, 8)
    per_plane = 2 * subl * lanes * 4            # double-buffered f32 plane
    bt = int(max(1, min(batch, budget_bytes // max(per_plane, 1))))
    while batch % bt:
        bt -= 1
    return bt


def _prep_attention_params(p_user, p_item, L, E, Lq):
    """Stack user/item Attention params along a leading arm axis and pre-shape
    them for the kernel (banded conv matmuls, zero-padded gate/cnn1 weights)."""
    Lc, Ec = L - (KH - 1), E - (KW - 1)
    col_ok = (jnp.arange(E) < Ec).astype(jnp.float32)[None, :]

    def shift_mats(w):                          # (KH, KW) -> (KH, E, E)
        mats = []
        for dr in range(KH):
            m = jnp.zeros((E, E), jnp.float32)
            for dc in range(KW):
                m = m + w[dr, dc] * (jnp.eye(E, E, k=-dc, dtype=jnp.float32) * col_ok)
            mats.append(m)
        return jnp.stack(mats)

    def pad_wa(w):                              # (Lc, Ec) -> (Lq, E)
        return jnp.zeros((Lq, E), jnp.float32).at[:Lc, :Ec].set(w)

    def pad_w1(w):                              # (Ec, C) -> (E, C)
        return jnp.zeros((E, w.shape[1]), jnp.float32).at[:Ec].set(w)

    wm = jnp.stack([shift_mats(p_user["w_cnn"]), shift_mats(p_item["w_cnn"])])
    bc = jnp.stack([p_user["b_cnn"][0], p_item["b_cnn"][0]])
    wa = jnp.stack([pad_wa(p_user["w_attn"]), pad_wa(p_item["w_attn"])])
    ba = jnp.stack([p_user["b_attn"][0], p_item["b_attn"][0]])
    w1 = jnp.stack([pad_w1(p_user["w_cnn1"]), pad_w1(p_item["w_cnn1"])])
    b1 = jnp.stack([p_user["b_cnn1"], p_item["b_cnn1"]])
    return wm, bc, wa, ba, w1, b1


def attention_pair_forward(user_x, user_s, item_x, item_s, p_user, p_item):
    """Runs user_Attention and item_Attention (+ fcLayer ReLU) in ONE pallas_call.

    user_x/item_x: (B, L, E) f32, user_s/item_s: (B, L) f32.
    Returns (2, B, C): [user_attn; item_attn], already ReLU'd.
    """
    B, L, E = user_x.shape
    C = p_user["w_cnn1"].shape[1]
    Lc = L - (KH - 1)
    Lq = _round_up(Lc, 8)          # conv-output rows per plane (8-aligned reshape)
    Lpad = Lq + (KH - 1)           # input rows per plane incl. zero padding

    x = jnp.stack([user_x, item_x])                    # (2, B, L, E)
    s = jnp.stack([user_s, item_s])[..., None]         # (2, B, L, 1)
    pad = Lpad - L
    if pad:
        x = jnp.pad(x, ((0, 0), (0, 0), (0, pad), (0, 0)))
        s = jnp.pad(s, ((0, 0), (0, 0), (0, pad), (0, 0)))

    wm, bc, wa, ba, w1, b1 = _prep_attention_params(p_user, p_item, L, E, Lq)

    Bt = _pick_batch_tile(B, Lpad, E)
    grid = (2, B // Bt)
    kernel = functools.partial(attention_kernel, lc=Lc, lq=Lq)

    out = pl.pallas_call(
        kernel,
        out_shape=jax.ShapeDtypeStruct((2, B, 1, C), jnp.float32),
        grid_spec=pltpu.PrefetchScalarGridSpec(
            num_scalar_prefetch=0,
            grid=grid,
            in_specs=[
                pl.BlockSpec((None, Bt, Lpad, E), lambda a, b: (a, b, 0, 0)),   # x
                pl.BlockSpec((None, Bt, Lpad, 1), lambda a, b: (a, b, 0, 0)),   # senti
                pl.BlockSpec((None, KH, E, E), lambda a, b: (a, 0, 0, 0)),      # conv mats
                pl.BlockSpec(memory_space=pltpu.MemorySpace.SMEM),              # b_cnn (2,)
                pl.BlockSpec((None, Lq, E), lambda a, b: (a, 0, 0)),            # w_attn
                pl.BlockSpec(memory_space=pltpu.MemorySpace.SMEM),              # b_attn (2,)
                pl.BlockSpec((None, E, C), lambda a, b: (a, 0, 0)),             # w_cnn1
                pl.BlockSpec((None, 1, C), lambda a, b: (a, 0, 0)),             # b_cnn1
            ],
            out_specs=pl.BlockSpec((None, Bt, 1, C), lambda a, b: (a, b, 0, 0)),
        ),
        compiler_params=pltpu.CompilerParams(
            dimension_semantics=("parallel", "parallel")),
    )(x, s, wm, bc, wa, ba, w1, b1)
    return out[:, :, 0, :]                             # (2, B, C)


# ----------------------------------------------------------------------------
# Parameter init (deterministic, shapes follow the module __init__)
# ----------------------------------------------------------------------------
def init_senti_attn_params(key, input_size, embed_size, channels, emb_dim,
                           num_users, num_items):
    L = 2 * input_size
    Lc, Ec = L - 4, embed_size - 4
    keys = jax.random.split(key, 4)

    def u(k, shape, s=0.1):
        return jax.random.uniform(k, shape, jnp.float32, -s, s)

    def attn_params(k):
        ks = jax.random.split(k, 6)
        return dict(
            w_cnn=u(ks[0], (KH, KW)),              # Conv2d(1,1,(5,5)) weight
            b_cnn=u(ks[1], (1,)),
            w_attn=u(ks[2], (Lc, Ec)),             # Conv2d(1,1,(Lc,Ec)) weight
            b_attn=u(ks[3], (1,)),
            w_cnn1=u(ks[4], (Ec, channels)),       # Conv2d(1,C,(1,Ec)) weight, stored (Ec, C)
            b_cnn1=u(ks[5], (1, channels)),
        )

    return dict(
        user_attention=attn_params(keys[0]),
        item_attention=attn_params(keys[1]),
        user_emb=0.1 * jax.random.normal(keys[2], (num_users + 1, emb_dim), jnp.float32),
        item_emb=0.1 * jax.random.normal(keys[3], (num_items + 1, emb_dim), jnp.float32),
        user_bias=jnp.zeros((num_users + 1, 1), jnp.float32),   # module fills 0.0
        item_bias=jnp.zeros((num_items + 1, 1), jnp.float32),   # module fills 0.0
        global_bias=jnp.zeros((1,), jnp.float32),
    )


# ----------------------------------------------------------------------------
# SentiAttn forward (glue in plain JAX, hot path in the fused Pallas kernel)
# ----------------------------------------------------------------------------
def senti_attn_forward(params, user_id, item_id,
                       x_user_pos, x_user_neg, x_item_pos, x_item_neg,
                       user_pos_senti, user_neg_senti,
                       item_pos_senti, item_neg_senti):
    user_x = jnp.concatenate([x_user_pos, x_user_neg], axis=1)
    user_s = jnp.concatenate([user_pos_senti, user_neg_senti], axis=1)
    item_x = jnp.concatenate([x_item_pos, x_item_neg], axis=1)
    item_s = jnp.concatenate([item_pos_senti, item_neg_senti], axis=1)

    attn = attention_pair_forward(user_x, user_s, item_x, item_s,
                                  params["user_attention"],
                                  params["item_attention"])
    user_attn, item_attn = attn[0], attn[1]             # (B, C), already ReLU'd

    user_emb = params["user_emb"][user_id]               # (B, emb_dim)
    item_emb = params["item_emb"][item_id]
    user_vec = jnp.concatenate([user_attn, user_emb], axis=1)
    item_vec = jnp.concatenate([item_attn, item_emb], axis=1)

    # Final prediction is a handful of FLOPs: cheaper as plain jnp than a
    # dedicated pallas_call (per perf review).
    dot = jnp.sum(user_vec * item_vec, axis=1, keepdims=True)      # (B, 1)
    return (dot + params["user_bias"][user_id] + params["item_bias"][item_id]
            + params["global_bias"][0])


# ----------------------------------------------------------------------------
# Pure-JAX reference (lax.conv based) for correctness checking
# ----------------------------------------------------------------------------
def attention_ref(x, senti, p):
    xs = x * senti[:, :, None]
    xi = xs[:, None, :, :]                                   # NCHW
    h = jax.lax.conv_general_dilated(xi, p["w_cnn"][None, None], (1, 1),
                                     "VALID") + p["b_cnn"][0]
    h = jnp.maximum(h, 0.0)                                  # (B,1,Lc,Ec)
    g = jax.lax.conv_general_dilated(h, p["w_attn"][None, None], (1, 1),
                                     "VALID") + p["b_attn"][0]
    g = jax.nn.sigmoid(g)                                    # (B,1,1,1)
    o = h * g
    w1_oihw = jnp.transpose(p["w_cnn1"])[:, None, None, :]   # (C,1,1,Ec)
    y = jax.lax.conv_general_dilated(o, w1_oihw, (1, 1), "VALID")
    y = y + p["b_cnn1"][0][None, :, None, None]              # (B,C,Lc,1)
    t = jnp.tanh(y)
    return jnp.max(t, axis=2)[:, :, 0]                       # (B, C)


def senti_attn_ref(params, user_id, item_id,
                   x_user_pos, x_user_neg, x_item_pos, x_item_neg,
                   user_pos_senti, user_neg_senti,
                   item_pos_senti, item_neg_senti):
    user_x = jnp.concatenate([x_user_pos, x_user_neg], axis=1)
    user_s = jnp.concatenate([user_pos_senti, user_neg_senti], axis=1)
    item_x = jnp.concatenate([x_item_pos, x_item_neg], axis=1)
    item_s = jnp.concatenate([item_pos_senti, item_neg_senti], axis=1)
    user_attn = jnp.maximum(attention_ref(user_x, user_s, params["user_attention"]), 0.0)
    item_attn = jnp.maximum(attention_ref(item_x, item_s, params["item_attention"]), 0.0)
    user_vec = jnp.concatenate([user_attn, params["user_emb"][user_id]], axis=1)
    item_vec = jnp.concatenate([item_attn, params["item_emb"][item_id]], axis=1)
    out = (jnp.sum(user_vec * item_vec, axis=1)
           + params["user_bias"][user_id][:, 0]
           + params["item_bias"][item_id][:, 0]
           + params["global_bias"][0])
    return out[:, None]


if __name__ == "__main__":
    B = 2
    input_size = 8          # reviews per polarity
    embed_size = 16
    channels = 8
    emb_dim = 8
    num_users, num_items = 5, 6

    key = jax.random.PRNGKey(0)
    kp, kd = jax.random.split(key)
    params = init_senti_attn_params(kp, input_size, embed_size, channels,
                                    emb_dim, num_users, num_items)

    dk = jax.random.split(kd, 8)
    x_user_pos = jax.random.normal(dk[0], (B, input_size, embed_size), jnp.float32)
    x_user_neg = jax.random.normal(dk[1], (B, input_size, embed_size), jnp.float32)
    x_item_pos = jax.random.normal(dk[2], (B, input_size, embed_size), jnp.float32)
    x_item_neg = jax.random.normal(dk[3], (B, input_size, embed_size), jnp.float32)
    user_pos_senti = jax.random.uniform(dk[4], (B, input_size), jnp.float32)
    user_neg_senti = jax.random.uniform(dk[5], (B, input_size), jnp.float32)
    item_pos_senti = jax.random.uniform(dk[6], (B, input_size), jnp.float32)
    item_neg_senti = jax.random.uniform(dk[7], (B, input_size), jnp.float32)
    user_id = jnp.array([1, 3], dtype=jnp.int32)
    item_id = jnp.array([0, 4], dtype=jnp.int32)

    out = senti_attn_forward(params, user_id, item_id,
                             x_user_pos, x_user_neg, x_item_pos, x_item_neg,
                             user_pos_senti, user_neg_senti,
                             item_pos_senti, item_neg_senti)
    out = jax.block_until_ready(out)
    assert out.shape == (B, 1)

    ref = senti_attn_ref(params, user_id, item_id,
                         x_user_pos, x_user_neg, x_item_pos, x_item_neg,
                         user_pos_senti, user_neg_senti,
                         item_pos_senti, item_neg_senti)
    # Tolerance allows for MXU f32 pass-count differences vs the XLA conv ref.
    np.testing.assert_allclose(np.asarray(out), np.asarray(ref),
                               rtol=2e-3, atol=2e-3)
    print("KERNEL_OK")
</pallas_src>

<mosaic_0001>
module attributes {stable_mosaic.version = 11 : i64} {
  func.func @attention_kernel(%arg0: i32, %arg1: i32, %arg2: memref<1x2x20x16xf32, #tpu.memory_space<vmem>>, %arg3: memref<1x2x20x1xf32, #tpu.memory_space<vmem>>, %arg4: memref<1x5x16x16xf32, #tpu.memory_space<vmem>>, %arg5: memref<2xf32, #tpu.memory_space<smem>>, %arg6: memref<1x16x16xf32, #tpu.memory_space<vmem>>, %arg7: memref<2xf32, #tpu.memory_space<smem>>, %arg8: memref<1x16x8xf32, #tpu.memory_space<vmem>>, %arg9: memref<1x1x8xf32, #tpu.memory_space<vmem>>, %arg10: memref<1x2x1x8xf32, #tpu.memory_space<vmem>>) attributes {dimension_semantics = [#tpu.dimension_semantics<parallel>, #tpu.dimension_semantics<parallel>], iteration_bounds = array<i64: 2, 1>, scalar_prefetch = 0 : i64, scratch_operands = 0 : i64, tpu.core_type = #tpu.core_type<tc>, window_params = [{transform_indices = @transform_0, window_bounds = array<i64: 1, 2, 20, 16>}, {transform_indices = @transform_1, window_bounds = array<i64: 1, 2, 20, 1>}, {transform_indices = @transform_2, window_bounds = array<i64: 1, 5, 16, 16>}, {transform_indices = @transform_3, window_bounds = array<i64: 2>}, {transform_indices = @transform_4, window_bounds = array<i64: 1, 16, 16>}, {transform_indices = @transform_5, window_bounds = array<i64: 2>}, {transform_indices = @transform_6, window_bounds = array<i64: 1, 16, 8>}, {transform_indices = @transform_7, window_bounds = array<i64: 1, 1, 8>}, {transform_indices = @transform_8, window_bounds = array<i64: 1, 2, 1, 8>}]} {
    %cst = arith.constant 0.000000e+00 : f32
    %0 = vector.broadcast %cst : f32 to vector<32x16xf32>
    %c0 = arith.constant 0 : index
    %c0_0 = arith.constant 0 : index
    %c0_1 = arith.constant 0 : index
    %c0_2 = arith.constant 0 : index
    %1 = vector.load %arg2[%c0, %c0_0, %c0_1, %c0_2] : memref<1x2x20x16xf32, #tpu.memory_space<vmem>>, vector<1x2x16x16xf32>
    %2 = vector.shape_cast %1 : vector<1x2x16x16xf32> to vector<2x16x16xf32>
    %c0_3 = arith.constant 0 : index
    %c0_4 = arith.constant 0 : index
    %c0_5 = arith.constant 0 : index
    %c0_6 = arith.constant 0 : index
    %3 = vector.load %arg3[%c0_3, %c0_4, %c0_5, %c0_6] : memref<1x2x20x1xf32, #tpu.memory_space<vmem>>, vector<1x2x16x1xf32>
    %4 = vector.shape_cast %3 : vector<1x2x16x1xf32> to vector<2x16x1xf32>
    %5 = vector.broadcast %4 : vector<2x16x1xf32> to vector<2x16x16xf32>
    %6 = arith.mulf %2, %5 : vector<2x16x16xf32>
    %7 = vector.shape_cast %6 : vector<2x16x16xf32> to vector<32x16xf32>
    %c0_7 = arith.constant 0 : index
    %c0_8 = arith.constant 0 : index
    %c0_9 = arith.constant 0 : index
    %c0_10 = arith.constant 0 : index
    %8 = vector.load %arg4[%c0_7, %c0_8, %c0_9, %c0_10] : memref<1x5x16x16xf32, #tpu.memory_space<vmem>>, vector<1x1x16x16xf32>
    %9 = vector.shape_cast %8 : vector<1x1x16x16xf32> to vector<16x16xf32>
    %cst_11 = arith.constant dense<0.000000e+00> : vector<32x16xf32>
    %10 = tpu.matmul %7, %9, %cst_11 {dimension_numbers = #tpu.dot_dimension_numbers<[1], [0], [0], [1], [0, 0, 1, 1], [], []>} : vector<32x16xf32>, vector<16x16xf32>, vector<32x16xf32> -> vector<32x16xf32>
    %11 = arith.addf %0, %10 : vector<32x16xf32>
    %c0_12 = arith.constant 0 : index
    %c0_13 = arith.constant 0 : index
    %c1 = arith.constant 1 : index
    %c0_14 = arith.constant 0 : index
    %12 = vector.load %arg2[%c0_12, %c0_13, %c1, %c0_14] : memref<1x2x20x16xf32, #tpu.memory_space<vmem>>, vector<1x2x16x16xf32>
    %13 = vector.shape_cast %12 : vector<1x2x16x16xf32> to vector<2x16x16xf32>
    %c0_15 = arith.constant 0 : index
    %c0_16 = arith.constant 0 : index
    %c1_17 = arith.constant 1 : index
    %c0_18 = arith.constant 0 : index
    %14 = vector.load %arg3[%c0_15, %c0_16, %c1_17, %c0_18] : memref<1x2x20x1xf32, #tpu.memory_space<vmem>>, vector<1x2x16x1xf32>
    %15 = vector.shape_cast %14 : vector<1x2x16x1xf32> to vector<2x16x1xf32>
    %16 = vector.broadcast %15 : vector<2x16x1xf32> to vector<2x16x16xf32>
    %17 = arith.mulf %13, %16 : vector<2x16x16xf32>
    %18 = vector.shape_cast %17 : vector<2x16x16xf32> to vector<32x16xf32>
    %c0_19 = arith.constant 0 : index
    %c1_20 = arith.constant 1 : index
    %c0_21 = arith.constant 0 : index
    %c0_22 = arith.constant 0 : index
    %19 = vector.load %arg4[%c0_19, %c1_20, %c0_21, %c0_22] : memref<1x5x16x16xf32, #tpu.memory_space<vmem>>, vector<1x1x16x16xf32>
    %20 = vector.shape_cast %19 : vector<1x1x16x16xf32> to vector<16x16xf32>
    %cst_23 = arith.constant dense<0.000000e+00> : vector<32x16xf32>
    %21 = tpu.matmul %18, %20, %cst_23 {dimension_numbers = #tpu.dot_dimension_numbers<[1], [0], [0], [1], [0, 0, 1, 1], [], []>} : vector<32x16xf32>, vector<16x16xf32>, vector<32x16xf32> -> vector<32x16xf32>
    %22 = arith.addf %11, %21 : vector<32x16xf32>
    %c0_24 = arith.constant 0 : index
    %c0_25 = arith.constant 0 : index
    %c2 = arith.constant 2 : index
    %c0_26 = arith.constant 0 : index
    %23 = vector.load %arg2[%c0_24, %c0_25, %c2, %c0_26] : memref<1x2x20x16xf32, #tpu.memory_space<vmem>>, vector<1x2x16x16xf32>
    %24 = vector.shape_cast %23 : vector<1x2x16x16xf32> to vector<2x16x16xf32>
    %c0_27 = arith.constant 0 : index
    %c0_28 = arith.constant 0 : index
    %c2_29 = arith.constant 2 : index
    %c0_30 = arith.constant 0 : index
    %25 = vector.load %arg3[%c0_27, %c0_28, %c2_29, %c0_30] : memref<1x2x20x1xf32, #tpu.memory_space<vmem>>, vector<1x2x16x1xf32>
    %26 = vector.shape_cast %25 : vector<1x2x16x1xf32> to vector<2x16x1xf32>
    %27 = vector.broadcast %26 : vector<2x16x1xf32> to vector<2x16x16xf32>
    %28 = arith.mulf %24, %27 : vector<2x16x16xf32>
    %29 = vector.shape_cast %28 : vector<2x16x16xf32> to vector<32x16xf32>
    %c0_31 = arith.constant 0 : index
    %c2_32 = arith.constant 2 : index
    %c0_33 = arith.constant 0 : index
    %c0_34 = arith.constant 0 : index
    %30 = vector.load %arg4[%c0_31, %c2_32, %c0_33, %c0_34] : memref<1x5x16x16xf32, #tpu.memory_space<vmem>>, vector<1x1x16x16xf32>
    %31 = vector.shape_cast %30 : vector<1x1x16x16xf32> to vector<16x16xf32>
    %cst_35 = arith.constant dense<0.000000e+00> : vector<32x16xf32>
    %32 = tpu.matmul %29, %31, %cst_35 {dimension_numbers = #tpu.dot_dimension_numbers<[1], [0], [0], [1], [0, 0, 1, 1], [], []>} : vector<32x16xf32>, vector<16x16xf32>, vector<32x16xf32> -> vector<32x16xf32>
    %33 = arith.addf %22, %32 : vector<32x16xf32>
    %c0_36 = arith.constant 0 : index
    %c0_37 = arith.constant 0 : index
    %c3 = arith.constant 3 : index
    %c0_38 = arith.constant 0 : index
    %34 = vector.load %arg2[%c0_36, %c0_37, %c3, %c0_38] : memref<1x2x20x16xf32, #tpu.memory_space<vmem>>, vector<1x2x16x16xf32>
    %35 = vector.shape_cast %34 : vector<1x2x16x16xf32> to vector<2x16x16xf32>
    %c0_39 = arith.constant 0 : index
    %c0_40 = arith.constant 0 : index
    %c3_41 = arith.constant 3 : index
    %c0_42 = arith.constant 0 : index
    %36 = vector.load %arg3[%c0_39, %c0_40, %c3_41, %c0_42] : memref<1x2x20x1xf32, #tpu.memory_space<vmem>>, vector<1x2x16x1xf32>
    %37 = vector.shape_cast %36 : vector<1x2x16x1xf32> to vector<2x16x1xf32>
    %38 = vector.broadcast %37 : vector<2x16x1xf32> to vector<2x16x16xf32>
    %39 = arith.mulf %35, %38 : vector<2x16x16xf32>
    %40 = vector.shape_cast %39 : vector<2x16x16xf32> to vector<32x16xf32>
    %c0_43 = arith.constant 0 : index
    %c3_44 = arith.constant 3 : index
    %c0_45 = arith.constant 0 : index
    %c0_46 = arith.constant 0 : index
    %41 = vector.load %arg4[%c0_43, %c3_44, %c0_45, %c0_46] : memref<1x5x16x16xf32, #tpu.memory_space<vmem>>, vector<1x1x16x16xf32>
    %42 = vector.shape_cast %41 : vector<1x1x16x16xf32> to vector<16x16xf32>
    %cst_47 = arith.constant dense<0.000000e+00> : vector<32x16xf32>
    %43 = tpu.matmul %40, %42, %cst_47 {dimension_numbers = #tpu.dot_dimension_numbers<[1], [0], [0], [1], [0, 0, 1, 1], [], []>} : vector<32x16xf32>, vector<16x16xf32>, vector<32x16xf32> -> vector<32x16xf32>
    %44 = arith.addf %33, %43 : vector<32x16xf32>
    %c0_48 = arith.constant 0 : index
    %c0_49 = arith.constant 0 : index
    %c4 = arith.constant 4 : index
    %c0_50 = arith.constant 0 : index
    %45 = vector.load %arg2[%c0_48, %c0_49, %c4, %c0_50] : memref<1x2x20x16xf32, #tpu.memory_space<vmem>>, vector<1x2x16x16xf32>
    %46 = vector.shape_cast %45 : vector<1x2x16x16xf32> to vector<2x16x16xf32>
    %c0_51 = arith.constant 0 : index
    %c0_52 = arith.constant 0 : index
    %c4_53 = arith.constant 4 : index
    %c0_54 = arith.constant 0 : index
    %47 = vector.load %arg3[%c0_51, %c0_52, %c4_53, %c0_54] : memref<1x2x20x1xf32, #tpu.memory_space<vmem>>, vector<1x2x16x1xf32>
    %48 = vector.shape_cast %47 : vector<1x2x16x1xf32> to vector<2x16x1xf32>
    %49 = vector.broadcast %48 : vector<2x16x1xf32> to vector<2x16x16xf32>
    %50 = arith.mulf %46, %49 : vector<2x16x16xf32>
    %51 = vector.shape_cast %50 : vector<2x16x16xf32> to vector<32x16xf32>
    %c0_55 = arith.constant 0 : index
    %c4_56 = arith.constant 4 : index
    %c0_57 = arith.constant 0 : index
    %c0_58 = arith.constant 0 : index
    %52 = vector.load %arg4[%c0_55, %c4_56, %c0_57, %c0_58] : memref<1x5x16x16xf32, #tpu.memory_space<vmem>>, vector<1x1x16x16xf32>
    %53 = vector.shape_cast %52 : vector<1x1x16x16xf32> to vector<16x16xf32>
    %cst_59 = arith.constant dense<0.000000e+00> : vector<32x16xf32>
    %54 = tpu.matmul %51, %53, %cst_59 {dimension_numbers = #tpu.dot_dimension_numbers<[1], [0], [0], [1], [0, 0, 1, 1], [], []>} : vector<32x16xf32>, vector<16x16xf32>, vector<32x16xf32> -> vector<32x16xf32>
    %55 = arith.addf %44, %54 : vector<32x16xf32>
    %56 = arith.index_cast %arg0 : i32 to index
    %57 = memref.load %arg5[%56] : memref<2xf32, #tpu.memory_space<smem>>
    %58 = vector.broadcast %57 : f32 to vector<32x16xf32>
    %59 = arith.addf %55, %58 : vector<32x16xf32>
    %cst_60 = arith.constant 0.000000e+00 : f32
    %60 = vector.broadcast %cst_60 : f32 to vector<32x16xf32>
    %61 = arith.maximumf %59, %60 : vector<32x16xf32>
    %62 = vector.shape_cast %61 : vector<32x16xf32> to vector<2x16x16xf32>
    %c0_61 = arith.constant 0 : index
    %c0_62 = arith.constant 0 : index
    %c0_63 = arith.constant 0 : index
    %63 = vector.load %arg6[%c0_61, %c0_62, %c0_63] : memref<1x16x16xf32, #tpu.memory_space<vmem>>, vector<1x16x16xf32>
    %64 = vector.shape_cast %63 : vector<1x16x16xf32> to vector<16x16xf32>
    %65 = vector.shape_cast %64 : vector<16x16xf32> to vector<1x16x16xf32>
    %66 = vector.broadcast %65 : vector<1x16x16xf32> to vector<2x16x16xf32>
    %67 = arith.mulf %62, %66 : vector<2x16x16xf32>
    %cst_64 = arith.constant dense<0.000000e+00> : vector<2x16xf32>
    %68 = vector.multi_reduction <add>, %67, %cst_64 [1] : vector<2x16x16xf32> to vector<2x16xf32>
    %69 = vector.shape_cast %68 : vector<2x16xf32> to vector<2x1x16xf32>
    %cst_65 = arith.constant dense<0.000000e+00> : vector<2x1xf32>
    %70 = vector.multi_reduction <add>, %69, %cst_65 [2] : vector<2x1x16xf32> to vector<2x1xf32>
    %71 = vector.shape_cast %70 : vector<2x1xf32> to vector<2x1x1xf32>
    %72 = arith.index_cast %arg0 : i32 to index
    %73 = memref.load %arg7[%72] : memref<2xf32, #tpu.memory_space<smem>>
    %74 = vector.broadcast %73 : f32 to vector<2x1x1xf32>
    %75 = arith.addf %71, %74 : vector<2x1x1xf32>
    %76 = arith.negf %75 : vector<2x1x1xf32>
    %77 = math.exp %76 : vector<2x1x1xf32>
    %cst_66 = arith.constant 1.000000e+00 : f32
    %78 = vector.broadcast %cst_66 : f32 to vector<2x1x1xf32>
    %79 = arith.addf %78, %77 : vector<2x1x1xf32>
    %80 = arith.divf %78, %79 : vector<2x1x1xf32>
    %81 = vector.broadcast %80 : vector<2x1x1xf32> to vector<2x16x16xf32>
    %82 = arith.mulf %62, %81 : vector<2x16x16xf32>
    %83 = vector.shape_cast %82 : vector<2x16x16xf32> to vector<32x16xf32>
    %c0_67 = arith.constant 0 : index
    %c0_68 = arith.constant 0 : index
    %c0_69 = arith.constant 0 : index
    %84 = vector.load %arg8[%c0_67, %c0_68, %c0_69] : memref<1x16x8xf32, #tpu.memory_space<vmem>>, vector<1x16x8xf32>
    %85 = vector.shape_cast %84 : vector<1x16x8xf32> to vector<16x8xf32>
    %cst_70 = arith.constant dense<0.000000e+00> : vector<32x8xf32>
    %86 = tpu.matmul %83, %85, %cst_70 {dimension_numbers = #tpu.dot_dimension_numbers<[1], [0], [0], [1], [0, 0, 1, 1], [], []>} : vector<32x16xf32>, vector<16x8xf32>, vector<32x8xf32> -> vector<32x8xf32>
    %87 = vector.shape_cast %86 : vector<32x8xf32> to vector<2x16x8xf32>
    %c0_71 = arith.constant 0 : index
    %c0_72 = arith.constant 0 : index
    %c0_73 = arith.constant 0 : index
    %88 = vector.load %arg9[%c0_71, %c0_72, %c0_73] : memref<1x1x8xf32, #tpu.memory_space<vmem>>, vector<1x1x8xf32>
    %89 = vector.shape_cast %88 : vector<1x1x8xf32> to vector<1x8xf32>
    %90 = vector.shape_cast %89 : vector<1x8xf32> to vector<1x1x8xf32>
    %91 = vector.broadcast %90 : vector<1x1x8xf32> to vector<2x16x8xf32>
    %92 = arith.addf %87, %91 : vector<2x16x8xf32>
    %93 = math.tanh %92 : vector<2x16x8xf32>
    %94 = tpu.iota {dimensions = array<i32: 1>} : vector<2x16x8xi32>
    %c12_i32 = arith.constant 12 : i32
    %95 = vector.broadcast %c12_i32 : i32 to vector<2x16x8xi32>
    %96 = arith.cmpi slt, %94, %95 : vector<2x16x8xi32>
    %cst_74 = arith.constant -2.000000e+00 : f32
    %97 = vector.broadcast %cst_74 : f32 to vector<2x16x8xf32>
    %98 = arith.select %96, %93, %97 : vector<2x16x8xi1>, vector<2x16x8xf32>
    %cst_75 = arith.constant dense<0xFF800000> : vector<2x8xf32>
    %99 = vector.multi_reduction <maximumf>, %98, %cst_75 [1] : vector<2x16x8xf32> to vector<2x8xf32>
    %cst_76 = arith.constant 0.000000e+00 : f32
    %100 = vector.broadcast %cst_76 : f32 to vector<2x8xf32>
    %101 = arith.maximumf %99, %100 : vector<2x8xf32>
    %102 = vector.shape_cast %101 : vector<2x8xf32> to vector<2x1x8xf32>
    %c0_77 = arith.constant 0 : index
    %c0_78 = arith.constant 0 : index
    %c0_79 = arith.constant 0 : index
    %c0_80 = arith.constant 0 : index
    %103 = vector.load %arg10[%c0_77, %c0_78, %c0_79, %c0_80] : memref<1x2x1x8xf32, #tpu.memory_space<vmem>>, vector<1x2x1x8xf32>
    %104 = vector.shape_cast %103 : vector<1x2x1x8xf32> to vector<2x1x8xf32>
    %105 = vector.shape_cast %102 : vector<2x1x8xf32> to vector<1x2x1x8xf32>
    tpu.vector_store %arg10[%c0_77, %c0_78, %c0_79, %c0_80], %105 {strides = array<i32>} : memref<1x2x1x8xf32, #tpu.memory_space<vmem>>, vector<1x2x1x8xf32>,
    return
  }
  func.func @transform_0(%arg0: i32, %arg1: i32) -> (i32, i32, i32, i32) {
    %c0_i32 = arith.constant 0 : i32
    %c0_i32_0 = arith.constant 0 : i32
    %c0_i32_1 = arith.constant 0 : i32
    return %arg0, %arg1, %c0_i32, %c0_i32_0 : i32, i32, i32, i32
  }
  func.func @transform_1(%arg0: i32, %arg1: i32) -> (i32, i32, i32, i32) {
    %c0_i32 = arith.constant 0 : i32
    %c0_i32_0 = arith.constant 0 : i32
    %c0_i32_1 = arith.constant 0 : i32
    return %arg0, %arg1, %c0_i32, %c0_i32_0 : i32, i32, i32, i32
  }
  func.func @transform_2(%arg0: i32, %arg1: i32) -> (i32, i32, i32, i32) {
    %c0_i32 = arith.constant 0 : i32
    %c0_i32_0 = arith.constant 0 : i32
    %c0_i32_1 = arith.constant 0 : i32
    %c0_i32_2 = arith.constant 0 : i32
    return %arg0, %c0_i32, %c0_i32_0, %c0_i32_1 : i32, i32, i32, i32
  }
  func.func @transform_3(%arg0: i32, %arg1: i32) -> i32 {
    %c0_i32 = arith.constant 0 : i32
    %c0_i32_0 = arith.constant 0 : i32
    return %c0_i32 : i32
  }
  func.func @transform_4(%arg0: i32, %arg1: i32) -> (i32, i32, i32) {
    %c0_i32 = arith.constant 0 : i32
    %c0_i32_0 = arith.constant 0 : i32
    %c0_i32_1 = arith.constant 0 : i32
    return %arg0, %c0_i32, %c0_i32_0 : i32, i32, i32
  }
  func.func @transform_5(%arg0: i32, %arg1: i32) -> i32 {
    %c0_i32 = arith.constant 0 : i32
    %c0_i32_0 = arith.constant 0 : i32
    return %c0_i32 : i32
  }
  func.func @transform_6(%arg0: i32, %arg1: i32) -> (i32, i32, i32) {
    %c0_i32 = arith.constant 0 : i32
    %c0_i32_0 = arith.constant 0 : i32
    %c0_i32_1 = arith.constant 0 : i32
    return %arg0, %c0_i32, %c0_i32_0 : i32, i32, i32
  }
  func.func @transform_7(%arg0: i32, %arg1: i32) -> (i32, i32, i32) {
    %c0_i32 = arith.constant 0 : i32
    %c0_i32_0 = arith.constant 0 : i32
    %c0_i32_1 = arith.constant 0 : i32
    return %arg0, %c0_i32, %c0_i32_0 : i32, i32, i32
  }
  func.func @transform_8(%arg0: i32, %arg1: i32) -> (i32, i32, i32, i32) {
    %c0_i32 = arith.constant 0 : i32
    %c0_i32_0 = arith.constant 0 : i32
    %c0_i32_1 = arith.constant 0 : i32
    return %arg0, %arg1, %c0_i32, %c0_i32_0 : i32, i32, i32, i32
  }
}

</mosaic_0001>

<bundles_post_ra>
// kernel: tpu_custom_call.1
= control target key start
LH: loop header
LB: loop body
LE: loop exit
PB: predicated region body
PF: predicated region fallthrough
CT: control target
= control target key end

     0   :  { %13 = vsyncpa [#allocation4], 0  ;;  %s2283_s0 = inlined_call_operand.vmem [shape: f32[2,2,20,16], index: 0, kind: input, shape index: {}]   ;;  %s2284_s1 = inlined_call_operand.vmem [shape: f32[2,2,20,1], index: 1, kind: input, shape index: {}]   ;;  %s2285_s2 = inlined_call_operand.vmem [shape: f32[2,5,16,16], index: 2, kind: input, shape index: {}]   ;;  %s2286_s3 = inlined_call_operand.vmem [shape: f32[2], index: 3, kind: input, shape index: {}]   ;;  %s2287_s4 = inlined_call_operand.vmem [shape: f32[2,16,16], index: 4, kind: input, shape index: {}]   ;;  %s2288_s5 = inlined_call_operand.vmem [shape: f32[2], index: 5, kind: input, shape index: {}]   ;;  %s2289_s6 = inlined_call_operand.vmem [shape: f32[2,16,8], index: 6, kind: input, shape index: {}]   ;;  %s2290_s7 = inlined_call_operand.vmem [shape: f32[2,1,8], index: 7, kind: input, shape index: {}]   ;;  %s2291_s8 = inlined_call_operand.hbm [shape: f32[2,2,1,8], index: 8, kind: output, shape index: {}]  }
   0x1   :  { %14 = vsyncpa [#allocation6], 0 }
   0x2   :  { %15 = vsyncpa [#allocation3], 0 }
   0x3   :  { %17 = vsyncpa [#allocation3 + $0x1], 0  ;;  %s2007_s27 = smov 0   ;;  %s2009_s28 = smov 0  }
   0x4   :  { %s2011_s29 = smov 0   ;;  %s2013_s30 = smov 0  }
   0x5   :  { %s2015_s9 = smov 0   ;;  %s2017_s10 = smov 0  }
   0x6 LB: > { %s1543_s11 = sadd.s32 4294967295, %s1954_s10   ;;  %s1544_s12 = sadd.s32 4294967294, %s1954_s10   ;;  %s1954_s10 = sphi %s2017_s10, %s23_s10   ;;  %s1950_s9 = sphi %s2015_s9, %s2309_s9   ;;  %s1946_s30 = sphi %s2013_s30, %s2308_s30   ;;  %s1942_s29 = sphi %s2011_s29, %s2307_s29   ;;  %s1938_s28 = sphi %s2009_s28, %s2306_s28   ;;  %s1934_s27 = sphi %s2007_s27, %s2305_s27  }
   0x7   : > { %s35_s13 = sadd.s32 1, %s1950_s9  ;;  %s246_s14 = sadd.s32 1, %s1942_s29 }
   0x8   : > { %p37_p0 = scmp.ge.s32.totalorder %s35_s13, 2  ;;  %p256_p1 = scmp.ne.s32.totalorder %s1942_s29, %s1938_s28 }
   0x9   : > { %p257_p2 = scmp.eq.s32.totalorder %s1543_s11, 1  ;;  %p262_p3 = scmp.ne.s32.totalorder %s1938_s28, %s1934_s27 }
   0xa   : > { %s2311_s13 = smov (%p37_p0, %s35_s13), 0  ;;  %p263_p5 = scmp.eq.s32.totalorder %s1544_s12, 1 }
   0xb   : > { %p2047_p4 = por %p257_p2, %p256_p1  ;;  %s241_s16 = ssub.s32 %s1950_s9, %s2311_s13 }
   0xc   : > { %p1545_p6 = scmp.ge.s32.totalorder %s1954_s10, 1  ;;  %p244_p7 = scmp.eq.s32.totalorder %s241_s16, 0 }
   0xd   : > { %s2296_s15 = scalar_select %p2047_p4, 1, 0 }
   0xe   : > { %p2054_p8 = por %p263_p5, %p262_p3  ;;  %p270_p9 = scmp.lt.s32.totalorder %s1954_s10, 3 }
   0xf   : > { %s2060_s18 = scalar_select %p244_p7, %s1942_s29, %s246_s14  }
  0x10   : > { %s2297_s17 = scalar_select %p2054_p8, 1, 0 }
  0x11   : > { %p2062_p10 = pnand %p1545_p6, %p270_p9  ;;  %p2066_p11 = scmp.eq.s32.totalorder %s1543_s11, 0 }
  0x12   : > { %s283_s23 = sshll.u32 %s2286_s3, 4  ;;  %s294_s26 = sshll.u32 %s2288_s5, 4  ;;  %s284_s23 = int_to_ptr.vmem [resolvable:$true] %s283_s23  ;;  %s295_s26 = int_to_ptr.vmem [resolvable:$true] %s294_s26 }
  0x13   : > { %s2298_s19 = scalar_select %p2062_p10, 1, 0 }
  0x14   : > { %s2299_s20 = scalar_select %p2066_p11, 1, 0 }
  0x15   : > { %p1751_p12 = pneg %p2062_p10  ;;  %s1838_s11 = scalar_lea.vmem %s284_s23, 16 }
  0x16   : > { %p1839_p0 = scmp.ne.s32.totalorder %s284_s23, %s1838_s11  ;;  %p1846_p5 = scmp.lt.s32.totalorder %s284_s23, %s284_s23 }
  0x17   : > { %p2080_p13 = pnand %p2066_p11, %p1751_p12  ;;  %p1847_p6 = scmp.lt.s32.totalorder %s1838_s11, %s1838_s11 }
  0x19   : > { %p1840_p1 = pneg %p2080_p13  ;;  %p1848_p7 = por %p1847_p6, %p1846_p5 }
  0x1b   : > { %p1841_p2 = pnand %p1840_p1, %p1839_p0 }
  0x1d   : > { %p1842_p3 = pneg %p1841_p2 }
  0x1f   : > { %p1849_p9 = pnand %p1848_p7, %p1842_p3 }
  0x21   : > { %1852 = shalt.err (!%p1849_p9)
}
  0x22   : > { %s1956_s14 = smov [#allocation2]   ;;  %s1853_s16 = scalar_lea.vmem %s295_s26, 16 }
  0x23   : > { %1754 = dma.vmem_to_smem (!%p2080_p13), %s284_s23, 16, %s1956_s14, [#allocation4]  }
  0x24   : > { %p1854_p12 = scmp.ne.s32.totalorder %s295_s26, %s1853_s16  ;;  %p1861_p11 = scmp.lt.s32.totalorder %s295_s26, %s295_s26 }
  0x25   : > { %p1862_p10 = scmp.lt.s32.totalorder %s1853_s16, %s1853_s16 }
  0x26   : > { %p1856_p8 = pnand %p1854_p12, %p1840_p1 }
  0x27   : > { %p1863_p0 = por %p1862_p10, %p1861_p11 }
  0x28   : > { %p1857_p4 = pneg %p1856_p8 }
  0x2a   : > { %p1864_p2 = pnand %p1863_p0, %p1857_p4 }
  0x2c   : > { %1867 = shalt.err (!%p1864_p2)
}
  0x2d   : > { %s1957_s21 = smov [#allocation5]   ;;  %p2301_p3 = scmp.ne.s32.totalorder %s2298_s19, 0 }
  0x2e   : > { %1757 = dma.vmem_to_smem (!%p2080_p13), %s295_s26, 16, %s1957_s21, [#allocation6]  }
  0x2f   : > { %365 = sbr.rel (%p2301_p3) target bundleno = 901 (0x385), region = 52  ;;  %p2302_p5 = scmp.ne.s32.totalorder (!%p2301_p3), %s2299_s20, 0 }
  0x36   : > { %1921 = dma.done.wait (%p2302_p5), [#allocation4], 16  }
  0x37   : > { %1923 = vsyncadd (%p2302_p5), [#allocation4], 4294967280 }
  0x38   : > { %1925 = dma.done.wait (%p2302_p5), [#allocation6], 16  }
  0x39   : > { %1927 = vsyncadd (%p2302_p5), [#allocation6], 4294967280 }
  0x3a   : > { %375 = sfence }
  0x3b   : > { %p438_p4 = scmp.lt.s32.totalorder %s1946_s30, 1  ;;  %v1958_v0 = vmov 0   ;;  %vm547_vm0 = vcmask 130048   ;;  %s1190_s14 = sld [smem:[#allocation5 + %s1946_s30]]  ;;  %vm1333_vm2 = vcmask 64512   ;;  %vm1354_vm3 = vcmask 57344  }
  0x3c   : > { %1821 = vset.pattern.permute.xlu1 %v1958_v0  ;;  %1820 = vset.pattern.permute.xlu0 %v1958_v0  ;;  %p2303_p10 = scmp.ne.s32.totalorder %s2296_s15, 0 }
  0x3d   : > { %s2102_s19 = scalar_select %p438_p4, %s1946_s30, 1 }
  0x3f   : > { %s1739_s22 = smul.u32 48, %s2102_s19  ;;  %s1600_s23 = sshll.u32 %s2102_s19, 4 }
  0x40   : > { %s1740_s20 = smul.u32 80, %s2102_s19 }
  0x41   : > { %s2110_s25 = scalar_lea.vmem %s2284_s1, %s1739_s22  ;;  %s2151_s21 = scalar_lea.vmem %s2283_s0, %s1739_s22 }
  0x42   : > { %v748_v1 = vld [vmem:[%s2110_s25 + $0x1a] sm:$0xff]  ;;  %v746_v2 = vld [vmem:[%s2110_s25 + $0x2] sm:$0xff]  ;;  %v747_v4 = vld [vmem:[%s2110_s25 + $0xa] sm:$0xff]  ;;  %s2120_s11 = scalar_lea.vmem %s2285_s2, %s1740_s20  ;;  %s1150_s22 = sld [smem:[#allocation2 + %s1946_s30]] }
  0x43   : > { %762 = vperm.xlu1 %1821, %v748_v1   ;;  %752 = vperm.xlu0 %1820, %v746_v2   ;;  %v749_v3 = vld [vmem:[%s2110_s25 + $0x22] sm:$0xff]  ;;  %v883_v10 = vld [vmem:[%s2110_s25 + $0xb] sm:$0xff]  ;;  %v1561_v12 = vld [vmem:[%s2120_s11 + $0x18] sm:$0xff]  ;;  %s468_s20 = scalar_lea.vmem %s2287_s4, %s1600_s23 }
  0x44   : > { %v882_v5 = vld [vmem:[%s2110_s25 + $0x3] sm:$0xff]  ;;  %v1560_v11 = vld [vmem:[%s2120_s11 + $0x10] sm:$0xff]  ;;  %v1577_v16 = vld [vmem:[%s2120_s11 + $0x38] sm:$0xff] }
  0x45   : > { %v516_v6 = vld [vmem:[%s2110_s25 + $0x1] sm:$0xff]  ;;  %v517_v13 = vld [vmem:[%s2110_s25 + $0x9] sm:$0xff]  ;;  %v1699_v14 = vpack.c.bf16 %v1561_v12, %v1560_v11  ;;  %v518_v19 = vld [vmem:[%s2110_s25 + $0x19] sm:$0xff] }
  0x46   : > { %v1570_v7 = vld [vmem:[%s2120_s11 + $0x20] sm:$0xff]  ;;  %v1571_v8 = vld [vmem:[%s2120_s11 + $0x28] sm:$0xff]  ;;  %v1576_v15 = vld [vmem:[%s2120_s11 + $0x30] sm:$0xff] }
  0x47   : > { %767 = vperm.xlu1 %1821, %v749_v3   ;;  %757 = vperm.xlu0 %1820, %v747_v4   ;;  %v1707_v9 = vpack.c.bf16 %v1571_v8, %v1570_v7  ;;  %v1711_v17 = vpack.c.bf16 %v1577_v16, %v1576_v15  ;;  %v884_v18 = vld [vmem:[%s2110_s25 + $0x1b] sm:$0xff]  ;;  %v885_v20 = vld [vmem:[%s2110_s25 + $0x23] sm:$0xff]  ;;  %v1019_v26 = vld [vmem:[%s2110_s25 + $0xc] sm:$0xff] }
  0x48   : > { %1700 = vmatprep.subr.bf16.mxu1 %v1699_v14  ;;  %v519_v21 = vld [vmem:[%s2110_s25 + $0x21] sm:$0xff]  ;;  %v484_v30 = vld [vmem:[%s2110_s25 + $0x18] sm:$0xff]  ;;  %v743_v37 = vld [vmem:[%s2151_s21 + $0xa] sm:$0xff] }
  0x49   : > { %1708 = vmatprep.subr.bf16.mxu0 %v1707_v9  ;;  %1702 = vmatpush3.bf16.msra.mxu1 %v1699_v14  ;;  %v1018_v22 = vld [vmem:[%s2110_s25 + $0x4] sm:$0xff]  ;;  %v1020_v29 = vld [vmem:[%s2110_s25 + $0x1c] sm:$0xff]  ;;  %v1015_v14 = vld [vmem:[%s2151_s21 + $0xc] sm:$0xff] }
  0x4a   : > { %1710 = vmatpush3.bf16.msra.mxu0 %v1707_v9  ;;  %v482_v23 = vld [vmem:[%s2110_s25] sm:$0xff]  ;;  %v511_v25 = vld [vmem:[%s2120_s11 + $0x8] sm:$0xff] }
  0x4b   : > { %888 = vperm.xlu1 %1821, %v882_v5   ;;  %522 = vperm.xlu0 %1820, %v516_v6   ;;  %v510_v24 = vld [vmem:[%s2120_s11] sm:$0xff]  ;;  %v483_v27 = vld [vmem:[%s2110_s25 + $0x8] sm:$0xff] }
  0x4c   : > { %1712 = vmatprep.subr.bf16.mxu0 %v1711_v17  ;;  %v1703_v28 = vpack.c.bf16 %v511_v25, %v510_v24  ;;  %v1021_v31 = vld [vmem:[%s2110_s25 + $0x24] sm:$0xff]  ;;  %v744_v40 = vld [vmem:[%s2151_s21 + $0x1a] sm:$0xff] }
  0x4d   : > { %v485_v32 = vld [vmem:[%s2110_s25 + $0x20] sm:$0xff]  ;;  %v1583_v39 = vld [vmem:[%s2120_s11 + $0x48] sm:$0xff]  ;;  %s1602_s25 = sshll.u32 %s1946_s30, 5  ;;  %s1959_s30 = smov [#allocation7]  }
  0x4e   : > { %1704 = vmatprep.subr.bf16.mxu1 %v1703_v28  ;;  %v742_v33 = vld [vmem:[%s2151_s21 + $0x2] sm:$0xff]  ;;  %v879_v54 = vld [vmem:[%s2151_s21 + $0xb] sm:$0xff]  ;;  %v514_v61 = vld [vmem:[%s2151_s21 + $0x19] sm:$0xff] }
  0x4f   : > { %893 = vperm.xlu1 %1821, %v883_v10   ;;  %527 = vperm.xlu0 %1820, %v517_v13   ;;  %v1582_v38 = vld [vmem:[%s2120_s11 + $0x40] sm:$0xff]  ;;  %v513_v55 = vld [vmem:[%s2151_s21 + $0x9] sm:$0xff]  ;;  %s473_s11 = scalar_lea.vmem %s2289_s6, %s1600_s23 }
  0x50   : > { %v1715_v44 = vpack.c.bf16 %v1583_v39, %v1582_v38  ;;  %v745_v46 = vld [vmem:[%s2151_s21 + $0x22] sm:$0xff] }
  0x51   : > { %v878_v47 = vld [vmem:[%s2151_s21 + $0x3] sm:$0xff]  ;;  %v880_v60 = vld [vmem:[%s2151_s21 + $0x1b] sm:$0xff] }
  0x52   : > { %v512_v48 = vld [vmem:[%s2151_s21 + $0x1] sm:$0xff] }
  0x53   : > { %898 = vperm.xlu1 %1821, %v884_v18   ;;  %532 = vperm.xlu0 %1820, %v518_v19   ;;  %v881_v2 = vld [vmem:[%s2151_s21 + $0x23] sm:$0xff] }
  0x54   : > { %v515_v3 = vld [vmem:[%s2151_s21 + $0x21] sm:$0xff] }
  0x55   : > { %v1014_v8 = vld [vmem:[%s2151_s21 + $0x4] sm:$0xff] }
  0x56   : > { %v478_v9 = vld [vmem:[%s2151_s21] sm:$0xff]  ;;  %v479_v15 = vld [vmem:[%s2151_s21 + $0x8] sm:$0xff] }
  0x57   : > { %903 = vperm.xlu1 %1821, %v885_v20   ;;  %537 = vperm.xlu0 %1820, %v519_v21   ;;  %v1016_v20 = vld [vmem:[%s2151_s21 + $0x1c] sm:$0xff] }
  0x58   : > { %v480_v21 = vld [vmem:[%s2151_s21 + $0x18] sm:$0xff] }
  0x5b   : > { %1024 = vperm.xlu1 %1821, %v1018_v22   ;;  %488 = vperm.xlu0 %1820, %v482_v23  }
  0x5f   : > { %1029 = vperm.xlu1 %1821, %v1019_v26   ;;  %493 = vperm.xlu0 %1820, %v483_v27   ;;  %v1017_v26 = vld [vmem:[%s2151_s21 + $0x24] sm:$0xff] }
  0x60   : > { %v481_v27 = vld [vmem:[%s2151_s21 + $0x20] sm:$0xff]  ;;  %s1872_s21 = sshll.u32 %s1959_s30, 4  ;;  %s1873_s21 = int_to_ptr.vmem [resolvable:$false] %s1872_s21 }
  0x63   : > { %1034 = vperm.xlu1 %1821, %v1020_v29   ;;  %498 = vperm.xlu0 %1820, %v484_v30  }
  0x67   : > { %1039 = vperm.xlu1 %1821, %v1021_v31   ;;  %503 = vperm.xlu0 %1820, %v485_v32  }
  0xc2   : > { %v763_v34 = vpop.permute.xlu1 %762  ;;  %v753_v35 = vpop.permute.xlu0 %752 }
  0xc3   : > { %v770_v36 = vmul.f32 %v753_v35, %v742_v33  ;;  %v772_v45 = vmul.f32 %v763_v34, %v744_v40  ;;  %v1151_v34 = vstv %s1150_s22  ;;  %v1161_v40 = vld [vmem:[%s468_s20 + $0x8] sm:$0xff]  ;;  %s476_s22 = scalar_lea.vmem %s2290_s7, %s2102_s19  ;;  %s434_s19 = sand.u32 1, %s1938_s28  }
  0xc4   : > { %s1552_s23 = sshll.u32 %s434_s19, 1 }
  0xc5   : > { %1663 = vmatprep.mubr.msk.f32.mxu0 %vm547_vm0, %v770_v36  ;;  %s436_s24 = scalar_lea.vmem [#allocation7], %s1552_s23 }
  0xc6   : > { %v768_v41 = vpop.permute.xlu1 %767  ;;  %v758_v42 = vpop.permute.xlu0 %757 }
  0xc7   : > { %v771_v43 = vmul.f32 %v758_v42, %v743_v37  ;;  %v773_v51 = vmul.f32 %v768_v41, %v745_v46 }
  0xc9   : > { %1664 = vmatmul.mubr.msk.f32.vlgmr.msra.gmra.mrb[0].mxu0 %vm547_vm0, %v771_v43  ;;  %v1160_v43 = vld [vmem:[%s468_s20] sm:$0xff]  ;;  %s1373_s20 = sshll.u32 %s436_s24, 4  ;;  %s2235_s20 = int_to_ptr.vmem [resolvable:$true] %s1373_s20 }
  0xca   : > { %v889_v49 = vpop.permute.xlu1 %888  ;;  %v523_v50 = vpop.permute.xlu0 %522  ;;  %1666 = vmatprep.mubr.msk.f32.mxu0 %vm547_vm0, %v772_v45  ;;  %1714 = vmatpush3.bf16.msra.mxu0 %v1711_v17  ;;  %s1868_s16 = scalar_lea.vmem %s2235_s20, 32  ;;  %p1875_p1 = scmp.lt.s32.totalorder %s2235_s20, %s1873_s21 }
  0xcb   : > { %v906_v52 = vmul.f32 %v889_v49, %v878_v47  ;;  %v540_v53 = vmul.f32 %v523_v50, %v512_v48  ;;  %1716 = vmatprep.subr.bf16.mxu0 %v1715_v44  ;;  %p1869_p8 = scmp.ne.s32.totalorder %s2235_s20, %s1868_s16 }
  0xcd   : > { %1643 = vmatprep.mubr.msk.f32.mxu1 %vm547_vm0, %v540_v53  ;;  %1667 = vmatmul.mubr.msk.f32.gmra.mrb[2].mxu0 %vm547_vm0, %v773_v51  ;;  %p1870_p11 = pnand %p1869_p8, %p2303_p10 }
  0xce   : > { %v894_v56 = vpop.permute.xlu1 %893  ;;  %v528_v57 = vpop.permute.xlu0 %527  ;;  %1673 = vmatprep.mubr.msk.f32.mxu0 %vm547_vm0, %v906_v52 }
  0xcf   : > { %v907_v58 = vmul.f32 %v894_v56, %v879_v54  ;;  %v541_v59 = vmul.f32 %v528_v57, %v513_v55  ;;  %p1871_p13 = pneg %p1870_p11 }
  0xd1   : > { %1644 = vmatmul.mubr.msk.f32.vlgmr.msra.gmra.mrb[0].mxu1 %vm547_vm0, %v541_v59  ;;  %1674 = vmatmul.mubr.msk.f32.vlgmr.msra.gmra.mrb[0].mxu0 %vm547_vm0, %v907_v58 }
  0xd2   : > { %v899_v62 = vpop.permute.xlu1 %898  ;;  %v533_v63 = vpop.permute.xlu0 %532  ;;  %1706 = vmatpush3.bf16.msra.mxu1 %v1703_v28  ;;  %1718 = vmatpush3.bf16.msra.mxu0 %v1715_v44 }
  0xd3   : > { %v908_v0 = vmul.f32 %v899_v62, %v880_v60  ;;  %v542_v1 = vmul.f32 %v533_v63, %v514_v61 }
  0xd5   : > { %1646 = vmatprep.mubr.msk.f32.mxu1 %vm547_vm0, %v542_v1  ;;  %1676 = vmatprep.mubr.msk.f32.mxu0 %vm547_vm0, %v908_v0 }
  0xd6   : > { %v904_v4 = vpop.permute.xlu1 %903  ;;  %v538_v5 = vpop.permute.xlu0 %537 }
  0xd7   : > { %v909_v6 = vmul.f32 %v904_v4, %v881_v2  ;;  %v543_v7 = vmul.f32 %v538_v5, %v515_v3 }
  0xd9   : > { %1647 = vmatmul.mubr.msk.f32.gmra.mrb[2].mxu1 %vm547_vm0, %v543_v7  ;;  %1677 = vmatmul.mubr.msk.f32.gmra.mrb[2].mxu0 %vm547_vm0, %v909_v6 }
  0xda   : > { %v1025_v10 = vpop.permute.xlu1 %1024  ;;  %v489_v11 = vpop.permute.xlu0 %488 }
  0xdb   : > { %v1042_v12 = vmul.f32 %v1025_v10, %v1014_v8  ;;  %v506_v13 = vmul.f32 %v489_v11, %v478_v9 }
  0xdd   : > { %1653 = vmatprep.mubr.msk.f32.mxu1 %vm547_vm0, %v506_v13  ;;  %1683 = vmatprep.mubr.msk.f32.mxu0 %vm547_vm0, %v1042_v12 }
  0xde   : > { %v1030_v16 = vpop.permute.xlu1 %1029  ;;  %v494_v17 = vpop.permute.xlu0 %493 }
  0xdf   : > { %v1043_v18 = vmul.f32 %v1030_v16, %v1015_v14  ;;  %v507_v19 = vmul.f32 %v494_v17, %v479_v15  ;;  %v1210_v15 = vld [vmem:[%s473_s11] sm:$0xff]  ;;  %v1211_v16 = vld [vmem:[%s473_s11 + $0x8] sm:$0xff]  ;;  %s2233_s11 = scalar_lea.hbm %s2291_s8, %s1602_s25 }
  0xe0   : > { %v1719_v17 = vpack.c.bf16 %v1211_v16, %v1210_v15 }
  0xe1   : > { %1654 = vmatmul.mubr.msk.f32.vlgmr.msra.gmra.mrb[0].mxu1 %vm547_vm0, %v507_v19  ;;  %1684 = vmatmul.mubr.msk.f32.vlgmr.msra.gmra.mrb[0].mxu0 %vm547_vm0, %v1043_v18  ;;  %v1191_v18 = vstv %s1190_s14  ;;  %s2237_s14 = scalar_lea.sflag [#allocation3], %s434_s19 }
  0xe2   : > { %v1035_v22 = vpop.permute.xlu1 %1034  ;;  %v499_v23 = vpop.permute.xlu0 %498  ;;  %1720 = vmatprep.subr.bf16.mxu1 %v1719_v17 }
  0xe3   : > { %v1044_v24 = vmul.f32 %v1035_v22, %v1016_v20  ;;  %v508_v25 = vmul.f32 %v499_v23, %v480_v21  ;;  %1722 = vmatpush3.bf16.msra.mxu1 %v1719_v17 }
  0xe5   : > { %1656 = vmatprep.mubr.msk.f32.mxu1 %vm547_vm0, %v508_v25  ;;  %1686 = vmatprep.mubr.msk.f32.mxu0 %vm547_vm0, %v1044_v24 }
  0xe6   : > { %v1040_v28 = vpop.permute.xlu1 %1039  ;;  %v504_v29 = vpop.permute.xlu0 %503 }
  0xe7   : > { %v1045_v30 = vmul.f32 %v1040_v28, %v1017_v26  ;;  %v509_v31 = vmul.f32 %v504_v29, %v481_v27 }
  0xe9   : > { %1657 = vmatmul.mubr.msk.f32.gmra.mrb[2].mxu1 %vm547_vm0, %v509_v31  ;;  %1687 = vmatmul.mubr.msk.f32.gmra.mrb[2].mxu0 %vm547_vm0, %v1045_v30 }
 0x1b4   : > { %v1655_v32 = vpop.f32.mrb[0].mxu1  ;;  %v1685_v33 = vpop.f32.mrb[0].mxu0 }
 0x1b5   : > { %v1723_v35 = vadd.f32 %v1685_v33, %v1655_v32  ;;  %v723_v36 = vpop.f32.mrb[1].mxu1  ;;  %v1127_v37 = vpop.f32.mrb[1].mxu0 }
 0x1b6   : > { %v1724_v38 = vadd.f32 %v1127_v37, %v723_v36  ;;  %v1324_v36 = vlaneseq }
 0x1b7   : > { %v2202_v39 = vadd.f32 %v1723_v35, %v1151_v34  ;;  %v1594_v35 = vld [vmem:[%s476_s22] ss:$0 sm:$0xff]  ;;  %s1874_s22 = scalar_lea.vmem %s1873_s21, 64 }
 0x1b8   : > { %v2204_v41 = vadd.f32 %v1724_v38, %v1151_v34  ;;  %p1876_p6 = scmp.lt.s32.totalorder %s1874_s22, %s1868_s16 }
 0x1b9   : > { %v1157_v42 = vmax.f32 %v2202_v39, 0.0 }
 0x1ba   : > { %v1156_v44 = vmax.f32 %v2204_v41, 0.0  ;;  %v1325_v41 = vshrl.u32 %v1324_v36, 7  ;;  %p1877_p7 = por %p1876_p6, %p1875_p1 }
 0x1bb   : > { %v1163_v45 = vmul.f32 %v1161_v40, %v1157_v42 }
 0x1bc   : > { %v1162_v46 = vmul.f32 %v1160_v43, %v1156_v44  ;;  %v1658_v47 = vpop.f32.mrb[2].mxu1  ;;  %v1688_v48 = vpop.f32.mrb[2].mxu0  ;;  %p1878_p9 = pnand %p1877_p7, %p1871_p13 }
 0x1bd   : > { %v1167_v49 = vsel %vm547_vm0, %v1163_v45, 0.0  ;;  %v1725_v50 = vadd.f32 %v1688_v48, %v1658_v47  ;;  %v733_v51 = vpop.f32.mrb[3].mxu1  ;;  %v1137_v52 = vpop.f32.mrb[3].mxu0 }
 0x1be   : > { %v1166_v53 = vsel %vm547_vm0, %v1162_v46, 0.0  ;;  %v1726_v54 = vadd.f32 %v1137_v52, %v733_v51 }
 0x1bf   : > { %v1168_v55 = vadd.f32 %v1167_v49, %v1166_v53  ;;  %v1155_v56 = vadd.f32 %v1725_v50, %v1151_v34 }
 0x1c0   : > { %v1154_v57 = vadd.f32 %v1726_v54, %v1151_v34 }
 0x1c1   : > { %v1159_v58 = vmax.f32 %v1155_v56, 0.0  ;;  %v1169_v59 = vrot.slane %v1168_v55, 4 }
 0x1c2   : > { %v1158_v60 = vmax.f32 %v1154_v57, 0.0 }
 0x1c3   : > { %v1165_v61 = vmul.f32 %v1161_v40, %v1159_v58  ;;  %v1170_v62 = vadd.f32 %v1169_v59, %v1168_v55 }
 0x1c4   : > { %v1164_v63 = vmul.f32 %v1160_v43, %v1158_v60 }
 0x1c5   : > { %v1176_v0 = vsel %vm547_vm0, %v1165_v61, 0.0  ;;  %v1171_v1 = vrot.slane %v1170_v62, 2 }
 0x1c6   : > { %v1175_v2 = vsel %vm547_vm0, %v1164_v63, 0.0 }
 0x1c7   : > { %v1177_v3 = vadd.f32 %v1176_v0, %v1175_v2  ;;  %v1172_v4 = vadd.f32 %v1171_v1, %v1170_v62 }
 0x1c9   : > { %v1173_v5 = vrot.slane %v1172_v4, 1  ;;  %v1178_v6 = vrot.slane %v1177_v3, 4 }
 0x1cb   : > { %v1174_v7 = vadd.f32 %v1173_v5, %v1172_v4  ;;  %v1179_v8 = vadd.f32 %v1178_v6, %v1177_v3 }
 0x1cd   : > { %v1184_v9 = vsel %vm547_vm0, %v1174_v7, 0.0  ;;  %v1180_v10 = vrot.slane %v1179_v8, 2 }
 0x1ce   : > { %1185 = vadd.xlane.f32.xlu0 %v1184_v9 }
 0x1cf   : > { %v1181_v11 = vadd.f32 %v1180_v10, %v1179_v8 }
 0x1d1   : > { %v1182_v12 = vrot.slane %v1181_v11, 1 }
 0x1d3   : > { %v1183_v13 = vadd.f32 %v1182_v12, %v1181_v11 }
 0x1d5   : > { %v1187_v14 = vsel %vm547_vm0, %v1183_v13, 0.0 }
 0x1d6   : > { %1188 = vadd.xlane.f32.xlu1 %v1187_v14 }
 0x25b   : > { %v1186_v19 = vpop.xlane.xlu0 %1185 }
 0x25c   : > { %v1192_v20 = vadd.f32 %v1191_v18, %v1186_v19 }
 0x25e   : > { %v1588_v21 = vmul.f32 -1.442695, %v1192_v20 }
 0x260   : > { %1822 = vpow2.f32 %v1588_v21 }
 0x263   : > { %v1189_v22 = vpop.xlane.xlu1 %1188 }
 0x264   : > { %v1193_v23 = vadd.f32 %v1191_v18, %v1189_v22 }
 0x266   : > { %v1589_v24 = vmul.f32 -1.442695, %v1193_v23 }
 0x268   : > { %1824 = vpow2.f32 %v1589_v24 }
 0x26a   : > { %v1823_v25 = vpop.eup %1822 }
 0x26b   : > { %v1200_v26 = vadd.f32 1.0, %v1823_v25 }
 0x26d   : > { %1826 = vrcp.f32 %v1200_v26 }
 0x272   : > { %v1825_v27 = vpop.eup %1824 }
 0x273   : > { %v1201_v28 = vadd.f32 1.0, %v1825_v27 }
 0x275   : > { %1828 = vrcp.f32 %v1201_v28 }
 0x277   : > { %v1827_v29 = vpop.eup %1826 }
 0x278   : > { %v1207_v30 = vmul.f32 %v1827_v29, %v1157_v42  ;;  %v1206_v31 = vmul.f32 %v1827_v29, %v1156_v44  ;;  %v1326_v42 = vadd.s32 8, %v1325_v41 }
 0x27a   : > { %1693 = vmatprep.mubr.msk.f32.mxu1 %vm547_vm0, %v1206_v31  ;;  %vm1328_vm1 = vcmp.lt.s32.totalorder %v1326_v42, 12 }
 0x27b   : > { %1694 = vmatmul.mubr.msk.f32.vlgmr.msra.gmra.mrb[4].mxu1 %vm547_vm0, %v1207_v30 }
 0x27f   : > { %v1829_v32 = vpop.eup %1828 }
 0x280   : > { %v1208_v33 = vmul.f32 %v1829_v32, %v1158_v60  ;;  %v1209_v34 = vmul.f32 %v1829_v32, %v1159_v58 }
 0x282   : > { %1696 = vmatprep.mubr.msk.f32.mxu1 %vm547_vm0, %v1208_v33 }
 0x283   : > { %1697 = vmatmul.mubr.msk.f32.gmra.mrb[6].mxu1 %vm547_vm0, %v1209_v34 }
 0x34e   : > { %v1695_v37 = vpop.f32.mrb[4].mxu1 }
 0x34f   : > { %v1317_v38 = vadd.f32 %v1695_v37, %v1594_v35  ;;  %v1290_v39 = vpop.f32.mrb[5].mxu1 }
 0x350   : > { %v1316_v40 = vadd.f32 %v1594_v35, %v1290_v39 }
 0x351   : > { %1830 = vtanh.f32 %v1317_v38 }
 0x352   : > { %1832 = vtanh.f32 %v1316_v40 }
 0x356   : > { %v1698_v43 = vpop.f32.mrb[6].mxu1 }
 0x357   : > { %v1319_v44 = vadd.f32 %v1698_v43, %v1594_v35  ;;  %v1300_v45 = vpop.f32.mrb[7].mxu1 }
 0x358   : > { %v1318_v46 = vadd.f32 %v1594_v35, %v1300_v45 }
 0x359   : > { %1834 = vtanh.f32 %v1319_v44 }
 0x35a   : > { %1836 = vtanh.f32 %v1318_v46 }
 0x35b   : > { %v1831_v47 = vpop.eup %1830 }
 0x35c   : > { %v1833_v48 = vpop.eup %1832  ;;  %v1330_v49 = vsel %vm1328_vm1, %v1831_v47, -2.0 }
 0x35d   : > { %v1335_v50 = vsel %vm1333_vm2, %v1330_v49, -inf  ;;  %v1334_v51 = vsel %vm1333_vm2, %v1833_v48, -inf }
 0x35e   : > { %v1336_v52 = vmax.f32 %v1334_v51, %v1335_v50 }
 0x360   : > { %v1337_v53 = vrot.slane %v1336_v52, 4 }
 0x362   : > { %v1338_v54 = vmax.f32 %v1336_v52, %v1337_v53 }
 0x363   : > { %v1835_v55 = vpop.eup %1834 }
 0x364   : > { %v1837_v56 = vpop.eup %1836  ;;  %v1339_v57 = vrot.slane %v1338_v54, 2  ;;  %v1332_v58 = vsel %vm1328_vm1, %v1835_v55, -2.0 }
 0x365   : > { %v1344_v59 = vsel %vm1333_vm2, %v1332_v58, -inf  ;;  %v1343_v60 = vsel %vm1333_vm2, %v1837_v56, -inf }
 0x366   : > { %v1340_v61 = vmax.f32 %v1338_v54, %v1339_v57  ;;  %v1345_v62 = vmax.f32 %v1343_v60, %v1344_v59 }
 0x368   : > { %v1346_v63 = vrot.slane %v1345_v62, 4  ;;  %v1341_v0 = vrot.slane %v1340_v61, 1 }
 0x36a   : > { %v1347_v1 = vmax.f32 %v1345_v62, %v1346_v63  ;;  %v1342_v2 = vmax.f32 %v1340_v61, %v1341_v0 }
 0x36c   : > { %v1348_v3 = vrot.slane %v1347_v1, 2  ;;  %v1352_v4 = vmax.f32 %v1342_v2, 0.0 }
 0x36e   : > { %v1349_v5 = vmax.f32 %v1347_v1, %v1348_v3  ;;  %1355 = vst.msk [vmem:[%s436_s24] sm:$0x1] %vm1354_vm3, %v1352_v4 }
 0x370   : > { %v1350_v6 = vrot.slane %v1349_v5, 1 }
 0x372   : > { %v1351_v7 = vmax.f32 %v1349_v5, %v1350_v6 }
 0x374   : > { %v1353_v8 = vmax.f32 %v1351_v7, 0.0 }
 0x376   : > { %1356 = vst.msk [vmem:[%s436_s24 + $0x1] sm:$0x1] %vm1354_vm3, %v1353_v8 }
 0x377   : > { %1881 = shalt.err (!%p1878_p9)
}
 0x378   : > { %s1882_s19 = scalar_lea.hbm %s2233_s11, 32  ;;  %s1886_s25 = scalar_lea.hbm %s2291_s8, 64 }
 0x379   : > { %p1883_p12 = scmp.ne.s32.totalorder %s2233_s11, %s1882_s19  ;;  %p1887_p3 = scmp.lt.u32.totalorder %s2233_s11, %s2291_s8 }
 0x37a   : > { %p1888_p5 = scmp.lt.u32.totalorder %s1886_s25, %s1882_s19  ;;  %p1890_p8 = scmp.lt.u32.totalorder %s1882_s19, %s2233_s11 }
 0x37b   : > { %p1884_p0 = pnand %p1883_p12, %p2303_p10 }
 0x37c   : > { %p1889_p4 = por %p1888_p5, %p1887_p3 }
 0x37d   : > { %p1885_p2 = pneg %p1884_p0 }
 0x37e   : > { %p1891_p11 = por %p1890_p8, %p1889_p4 }
 0x380   : > { %p1892_p13 = pnand %p1891_p11, %p1885_p2 }
 0x382   : > { %1895 = shalt.err (!%p1892_p13)
}
 0x383   : > { %s1960_s16 = smov 16   ;;  %s1961_s30 = smov 1  }
 0x384   : > { %1749 = dma.vmem_to_hbm [thread:$0]  (%p2303_p10), %s2235_s20, 32, %s2233_s11, %s2237_s14, %s1960_s16, %s1960_s16, %s1961_s30  }
 0x385 PF: > { %p1766_p1 = scmp.ge.s32.totalorder %s1954_s10, 2  ;;  %s1388_s21 = sand.u32 1, %s1934_s27  }
 0x386   : > { %p2304_p6 = scmp.ne.s32.totalorder %s2297_s17, 0  ;;  %s1389_s22 = scalar_lea.sflag [#allocation3], %s1388_s21 }
 0x388   : > { %p1759_p7 = pnand %p1766_p1, %p2304_p6 }
 0x38a   : > { %1929 = dma.done.wait (!%p1759_p7), %s1389_s22, 32  }
 0x38b   : > { %1931 = vsyncadd (!%p1759_p7), %s1389_s22, 4294967264  ;;  %s23_s10 = sadd.s32 1, %s1954_s10   ;;  %s2305_s27 = smov %s1938_s28 }
 0x38c   : > { %p20_p9 = scmp.ge.s32.totalorder %s23_s10, 4   ;;  %s2306_s28 = smov %s1942_s29 }
 0x38d   : > { %s2307_s29 = smov %s2060_s18  ;;  %s2308_s30 = smov %s1950_s9 }
 0x38e   : > { %s2309_s9 = smov %s2311_s13  ;;  %22 = sbr.rel (!%p20_p9) target bundleno = 6 (0x6), region = 115 }
 0x395   :  { %1394 = vsyncpa [#allocation3], 1 }
 0x396   :  { %1396 = vsyncpa [#allocation3 + $0x1], 1 }
 0x397   :  { %1397 = vsyncpa [#allocation4], 1 }
 0x398   :  { %1399 = vsyncpa [#allocation4 + $0x1], 1 }
 0x399   :  { %1400 = vsyncpa [#allocation6], 1 }

</bundles_post_ra>
